<compile_context>
chip_gen: v7x
topology: tpu7x:2x2x1
jax: 0.10.0
libtpu: 0.0.40
codegen_flags: <defaults>
</compile_context>

<pallas_src>
import numpy as np
import jax
import jax.numpy as jnp
from jax import lax
from jax.experimental import pallas as pl
from jax.experimental.pallas import tpu as pltpu


def _selection_matrix(H, W, dtype):
    """(H*W, H_out*W_out) 0/1 matrix mapping flat x[h*W+w] -> flat y[(h//2)*W_out+(w//2)]
    for even h and even w (== x[:, :, ::2, ::2] followed by a trailing-dim flatten)."""
    H_out, W_out = (H + 1) // 2, (W + 1) // 2
    idx = np.arange(H * W)
    h, w = idx // W, idx % W
    keep = (h % 2 == 0) & (w % 2 == 0)
    cols = (h // 2) * W_out + (w // 2)
    S = np.zeros((H * W, H_out * W_out), dtype=np.float32)
    S[idx[keep], cols[keep]] = 1.0
    return jnp.asarray(S, dtype=dtype)


def _cores_per_chip():
    """Best-effort TensorCore count of the local device (for parallel grid sharding)."""
    try:
        dev = jax.devices()[0]
        n = getattr(dev, "num_cores", None)
        if n:
            return max(1, int(n))
        kind = str(getattr(dev, "device_kind", "")).lower()
        if ("lite" in kind) or ("v5e" in kind) or ("v6" in kind):
            return 1                      # v5e / v6e: single TensorCore per chip
    except Exception:
        pass
    return 2                              # v4 / v5p / v7x (and unknown): assume 2


def _vmem_limit_bytes():
    """Scoped VMEM limit = half of physical VMEM (64 MiB on v5e/v6e, 32 MiB on v7x)."""
    try:
        cap = int(pltpu.get_tpu_info().vmem_capacity_bytes)
        return int(max(16 << 20, min(cap // 2, 64 << 20)))
    except Exception:
        return 32 << 20                   # safe default on every generation


def _choose_nb(N, C, C_out, L, M, itemsize, vmem_limit, target_steps):
    """Largest batch block Nb (divisor of N) such that
       - Nb*C is a legal second-minor block size (sublane-packing multiple, or full N*C),
       - double-buffered blocks + scratch fit in ~75% of the scoped VMEM limit,
       - the grid has >= target_steps steps when possible (2-TC parts)."""
    budget = int(0.75 * vmem_limit)
    s_bytes = L * M * itemsize
    min_mult = 8 * max(1, 4 // max(1, itemsize))   # 8 for f32, 16 for bf16, ...

    def fits(nb):
        in_blk = nb * C * L * itemsize
        out_blk = nb * C_out * M * itemsize
        scratch = nb * C * M * itemsize
        return 2 * (in_blk + out_blk) + 2 * s_bytes + scratch <= budget

    divisors = [d for d in range(N, 0, -1) if N % d == 0]
    legal = [d for d in divisors if d == N or (d * C) % min_mult == 0]
    for nb in legal:                      # honor the per-core step target first
        if N // nb >= target_steps and fits(nb):
            return nb
    for nb in legal:                      # else: the biggest block that fits
        if fits(nb):
            return nb
    return legal[-1]                      # last resort; let the compiler try


def _make_kernel(Nb, C, C_out, pad, M, out_dtype, precision):
    static_scatter = Nb <= 32             # fully static slices for small batch blocks

    def kernel(x_ref, s_ref, o_ref, y_ref):
        # x_ref: (Nb*C, L)   s_ref: (L, M)   o_ref: (Nb, C_out, M)   y_ref: (Nb*C, M)
        if pad > 0:
            zeros = jnp.zeros((Nb, pad, M), dtype=out_dtype)
            o_ref[:, :pad, :] = zeros            # lane-dense zero slabs: no input read
            o_ref[:, pad + C:, :] = zeros
        # One MXU matmul does the stride-2 subsample of both spatial dims AND the
        # flatten-to-lanes, so the stores below are all M (=H_out*W_out) lanes wide.
        y_ref[...] = jnp.dot(
            x_ref[...], s_ref[...],
            preferred_element_type=jnp.float32,
            precision=precision,
        ).astype(out_dtype)
        if static_scatter:
            for b in range(Nb):                  # static slices / stores
                o_ref[b, pad:pad + C, :] = y_ref[b * C:(b + 1) * C, :]
        else:
            def body(b, carry):
                o_ref[b, pad:pad + C, :] = y_ref[pl.ds(b * C, C), :]
                return carry
            lax.fori_loop(0, Nb, body, 0)

    return kernel


def lambda_layer_shortcut_a(x, planes):
    """Pallas implementation of:
       F.pad(x[:, :, ::2, ::2], (0,0,0,0, planes//4, planes//4), 'constant', 0)
    x: (N, C, H, W) NCHW.  returns: (N, C + 2*(planes//4), ceil(H/2), ceil(W/2))."""
    N, C, H, W = x.shape
    pad = planes // 4
    H_out, W_out = (H + 1) // 2, (W + 1) // 2
    C_out = C + 2 * pad
    L, M = H * W, H_out * W_out
    dtype = x.dtype
    itemsize = jnp.dtype(dtype).itemsize

    S = _selection_matrix(H, W, dtype)     # tiny constant; baked into the program
    x2 = x.reshape(N * C, L)               # free row-major collapse -> lane-dense loads

    vmem_limit = _vmem_limit_bytes()
    target_steps = _cores_per_chip()       # 1 step on v5e/v6e, 2 parallel steps on 2-TC
    Nb = _choose_nb(N, C, C_out, L, M, itemsize, vmem_limit, target_steps)

    precision = (jax.lax.Precision.HIGHEST
                 if dtype == jnp.float32 else jax.lax.Precision.DEFAULT)
    kernel = _make_kernel(Nb, C, C_out, pad, M, dtype, precision)

    cost = pl.CostEstimate(
        flops=2 * N * C * L * M,
        transcendentals=0,
        bytes_accessed=(N * C * L + L * M + N * C_out * M) * itemsize,
    )

    out = pl.pallas_call(
        kernel,
        out_shape=jax.ShapeDtypeStruct((N, C_out, M), dtype),
        grid_spec=pltpu.PrefetchScalarGridSpec(
            num_scalar_prefetch=0,
            grid=(N // Nb,),
            in_specs=[
                pl.BlockSpec((Nb * C, L), lambda n: (n, 0)),   # only real C channels
                pl.BlockSpec((L, M), lambda n: (0, 0)),        # S: fetched once
            ],
            out_specs=pl.BlockSpec((Nb, C_out, M), lambda n: (n, 0, 0)),
            scratch_shapes=[pltpu.VMEM((Nb * C, M), dtype)],
        ),
        compiler_params=pltpu.CompilerParams(
            dimension_semantics=("parallel",),
            vmem_limit_bytes=vmem_limit,
        ),
        cost_estimate=cost,
    )(x2, S)

    return out.reshape(N, C_out, H_out, W_out)   # free trailing-dim split


def _reference(x, planes):
    pad = planes // 4
    y = x[:, :, ::2, ::2]
    return jnp.pad(y, ((0, 0), (pad, pad), (0, 0), (0, 0)))


if __name__ == "__main__":
    key = jax.random.PRNGKey(0)
    # small shapes consistent with the ResNet option-A shortcut use-case
    N, C, H, W = 2, 4, 16, 16
    planes = 8                       # -> pad = 2 channels each side, C_out = 8
    x = jax.random.normal(key, (N, C, H, W), dtype=jnp.float32)

    out = jax.block_until_ready(lambda_layer_shortcut_a(x, planes))
    ref = _reference(x, planes)

    assert out.shape == ref.shape, (out.shape, ref.shape)
    assert jnp.allclose(out, ref, atol=1e-5, rtol=0), "mismatch vs reference"
    print("KERNEL_OK")
</pallas_src>

<mosaic_0001>
module attributes {stable_mosaic.version = 11 : i64} {
  func.func @kernel(%arg0: i32, %arg1: memref<8x256xf32, #tpu.memory_space<vmem>>, %arg2: memref<256x64xf32, #tpu.memory_space<vmem>>, %arg3: memref<2x8x64xf32, #tpu.memory_space<vmem>>, %arg4: memref<8x64xf32, #tpu.memory_space<vmem>>) attributes {dimension_semantics = [#tpu.dimension_semantics<parallel>], iteration_bounds = array<i64: 1>, scalar_prefetch = 0 : i64, scratch_operands = 1 : i64, tpu.core_type = #tpu.core_type<tc>, window_params = [{transform_indices = @transform_0, window_bounds = array<i64: 8, 256>}, {pipeline_mode = #tpu.pipeline_mode<synchronous>, transform_indices = @transform_1, window_bounds = array<i64: 256, 64>}, {transform_indices = @transform_2, window_bounds = array<i64: 2, 8, 64>}]} {
    %cst = arith.constant 0.000000e+00 : f32
    %0 = vector.broadcast %cst : f32 to vector<2x2x64xf32>
    %c0 = arith.constant 0 : index
    %c0_0 = arith.constant 0 : index
    %c0_1 = arith.constant 0 : index
    %1 = vector.load %arg3[%c0, %c0_0, %c0_1] : memref<2x8x64xf32, #tpu.memory_space<vmem>>, vector<2x2x64xf32>
    tpu.vector_store %arg3[%c0, %c0_0, %c0_1], %0 {strides = array<i32>} : memref<2x8x64xf32, #tpu.memory_space<vmem>>, vector<2x2x64xf32>,
    %c0_2 = arith.constant 0 : index
    %c6 = arith.constant 6 : index
    %c0_3 = arith.constant 0 : index
    %2 = vector.load %arg3[%c0_2, %c6, %c0_3] : memref<2x8x64xf32, #tpu.memory_space<vmem>>, vector<2x2x64xf32>
    tpu.vector_store %arg3[%c0_2, %c6, %c0_3], %0 {strides = array<i32>} : memref<2x8x64xf32, #tpu.memory_space<vmem>>, vector<2x2x64xf32>,
    %c0_4 = arith.constant 0 : index
    %c0_5 = arith.constant 0 : index
    %3 = vector.load %arg1[%c0_4, %c0_5] : memref<8x256xf32, #tpu.memory_space<vmem>>, vector<8x256xf32>
    %c0_6 = arith.constant 0 : index
    %c0_7 = arith.constant 0 : index
    %4 = vector.load %arg2[%c0_6, %c0_7] : memref<256x64xf32, #tpu.memory_space<vmem>>, vector<256x64xf32>
    %cst_8 = arith.constant dense<0.000000e+00> : vector<8x64xf32>
    %5 = tpu.matmul %3, %4, %cst_8 {dimension_numbers = #tpu.dot_dimension_numbers<[1], [0], [0], [1], [0, 0, 1, 1], [], []>, precision = #tpu.contract_precision<fp32>} : vector<8x256xf32>, vector<256x64xf32>, vector<8x64xf32> -> vector<8x64xf32>
    %c0_9 = arith.constant 0 : index
    %c0_10 = arith.constant 0 : index
    %6 = vector.load %arg4[%c0_9, %c0_10] : memref<8x64xf32, #tpu.memory_space<vmem>>, vector<8x64xf32>
    tpu.vector_store %arg4[%c0_9, %c0_10], %5 {strides = array<i32>} : memref<8x64xf32, #tpu.memory_space<vmem>>, vector<8x64xf32>,
    %c0_11 = arith.constant 0 : index
    %c0_12 = arith.constant 0 : index
    %7 = vector.load %arg4[%c0_11, %c0_12] : memref<8x64xf32, #tpu.memory_space<vmem>>, vector<4x64xf32>
    %c0_13 = arith.constant 0 : index
    %c2 = arith.constant 2 : index
    %c0_14 = arith.constant 0 : index
    %8 = vector.load %arg3[%c0_13, %c2, %c0_14] : memref<2x8x64xf32, #tpu.memory_space<vmem>>, vector<1x4x64xf32>
    %9 = vector.shape_cast %8 : vector<1x4x64xf32> to vector<4x64xf32>
    %10 = vector.shape_cast %7 : vector<4x64xf32> to vector<1x4x64xf32>
    tpu.vector_store %arg3[%c0_13, %c2, %c0_14], %10 {strides = array<i32>} : memref<2x8x64xf32, #tpu.memory_space<vmem>>, vector<1x4x64xf32>,
    %c4 = arith.constant 4 : index
    %c0_15 = arith.constant 0 : index
    %11 = vector.load %arg4[%c4, %c0_15] : memref<8x64xf32, #tpu.memory_space<vmem>>, vector<4x64xf32>
    %c1 = arith.constant 1 : index
    %c2_16 = arith.constant 2 : index
    %c0_17 = arith.constant 0 : index
    %12 = vector.load %arg3[%c1, %c2_16, %c0_17] : memref<2x8x64xf32, #tpu.memory_space<vmem>>, vector<1x4x64xf32>
    %13 = vector.shape_cast %12 : vector<1x4x64xf32> to vector<4x64xf32>
    %14 = vector.shape_cast %11 : vector<4x64xf32> to vector<1x4x64xf32>
    tpu.vector_store %arg3[%c1, %c2_16, %c0_17], %14 {strides = array<i32>} : memref<2x8x64xf32, #tpu.memory_space<vmem>>, vector<1x4x64xf32>,
    return
  }
  func.func @transform_0(%arg0: i32) -> (i32, i32) {
    %c0_i32 = arith.constant 0 : i32
    %c0_i32_0 = arith.constant 0 : i32
    return %arg0, %c0_i32 : i32, i32
  }
  func.func @transform_1(%arg0: i32) -> (i32, i32) {
    %c0_i32 = arith.constant 0 : i32
    %c0_i32_0 = arith.constant 0 : i32
    %c0_i32_1 = arith.constant 0 : i32
    return %c0_i32, %c0_i32_0 : i32, i32
  }
  func.func @transform_2(%arg0: i32) -> (i32, i32, i32) {
    %c0_i32 = arith.constant 0 : i32
    %c0_i32_0 = arith.constant 0 : i32
    %c0_i32_1 = arith.constant 0 : i32
    return %arg0, %c0_i32, %c0_i32_0 : i32, i32, i32
  }
}

</mosaic_0001>

<bundles_post_ra>
// kernel: tpu_custom_call.1
= control target key start
LH: loop header
LB: loop body
LE: loop exit
PB: predicated region body
PF: predicated region fallthrough
CT: control target
= control target key end

     0   :  { %s1898_s0 = inlined_call_operand.vmem [shape: f32[8,256], index: 0, kind: input, shape index: {}]   ;;  %s1899_s1 = inlined_call_operand.vmem [shape: f32[256,64], index: 1, kind: input, shape index: {}]   ;;  %s1900_s2 = inlined_call_operand.hbm [shape: f32[2,8,64], index: 2, kind: output, shape index: {}]  }
   0x1   :  { %v35_v0 = vld [vmem:[%s1899_s1 + $0x80] sm:$0xff]  ;;  %v36_v1 = vld [vmem:[%s1899_s1 + $0x88] sm:$0xff]  ;;  %v37_v7 = vld [vmem:[%s1899_s1 + $0x90] sm:$0xff] }
   0x2   :  { %v19_v2 = vld [vmem:[%s1899_s1] sm:$0xff]  ;;  %v100_v3 = vand.u32 4294901760, %v35_v0  ;;  %v103_v4 = vand.u32 4294901760, %v36_v1  ;;  %v20_v5 = vld [vmem:[%s1899_s1 + $0x8] sm:$0xff]  ;;  %v38_v8 = vld [vmem:[%s1899_s1 + $0x98] sm:$0xff]  ;;  %v106_v10 = vand.u32 4294901760, %v37_v7 }
   0x3   :  { %v52_v6 = vand.u32 4294901760, %v19_v2  ;;  %v55_v9 = vand.u32 4294901760, %v20_v5  ;;  %v109_v11 = vand.u32 4294901760, %v38_v8  ;;  %v21_v12 = vld [vmem:[%s1899_s1 + $0x10] sm:$0xff]  ;;  %v22_v13 = vld [vmem:[%s1899_s1 + $0x18] sm:$0xff]  ;;  %v39_v18 = vld [vmem:[%s1899_s1 + $0xa0] sm:$0xff] }
   0x4   :  { %v1410_v14 = vpack.c.bf16 %v103_v4, %v100_v3  ;;  %v58_v16 = vand.u32 4294901760, %v21_v12  ;;  %v61_v17 = vand.u32 4294901760, %v22_v13  ;;  %v40_v19 = vld [vmem:[%s1899_s1 + $0xa8] sm:$0xff]  ;;  %v23_v23 = vld [vmem:[%s1899_s1 + $0x20] sm:$0xff]  ;;  %v1433_v25 = vsub.f32 %v37_v7, %v106_v10  ;;  %v41_v37 = vld [vmem:[%s1899_s1 + $0xb0] sm:$0xff] }
   0x5   :  { %v1412_v15 = vsub.f32 %v19_v2, %v52_v6  ;;  %v1420_v20 = vpack.c.bf16 %v55_v9, %v52_v6  ;;  %v1422_v21 = vsub.f32 %v20_v5, %v55_v9  ;;  %v1424_v22 = vpack.c.bf16 %v109_v11, %v106_v10  ;;  %v24_v24 = vld [vmem:[%s1899_s1 + $0x28] sm:$0xff]  ;;  %v42_v42 = vld [vmem:[%s1899_s1 + $0xb8] sm:$0xff]  ;;  %v25_v55 = vld [vmem:[%s1899_s1 + $0x30] sm:$0xff] }
   0x6   :  { %1148 = vmatprep.subr.bf16.mxu0 %v1410_v14  ;;  %v1435_v26 = vsub.f32 %v38_v8, %v109_v11  ;;  %v1437_v27 = vpack.c.bf16 %v61_v17, %v58_v16  ;;  %v1439_v28 = vsub.f32 %v21_v12, %v58_v16  ;;  %v112_v29 = vand.u32 4294901760, %v39_v18  ;;  %v26_v56 = vld [vmem:[%s1899_s1 + $0x38] sm:$0xff] }
   0x7   :  { %1150 = vmatpush3.bf16.msra.mxu0 %v1420_v20  ;;  %v115_v30 = vand.u32 4294901760, %v40_v19  ;;  %v1442_v31 = vsub.f32 %v35_v0, %v100_v3  ;;  %v1444_v32 = vsub.f32 %v36_v1, %v103_v4  ;;  %v64_v33 = vand.u32 4294901760, %v23_v23 }
   0x8   :  { %1152 = vmatprep.subr.bf16.mxu0 %v1424_v22  ;;  %v67_v34 = vand.u32 4294901760, %v24_v24  ;;  %v1917_v35 = vand.u32 4294901760, %v1412_v15  ;;  %v1916_v36 = vand.u32 4294901760, %v1422_v21  ;;  %v1452_v38 = vsub.f32 %v22_v13, %v61_v17 }
   0x9   :  { %v1454_v39 = vpack.c.bf16 %v115_v30, %v112_v29  ;;  %v1456_v40 = vsub.f32 %v39_v18, %v112_v29  ;;  %v1922_v41 = vand.u32 4294901760, %v1442_v31  ;;  %v1462_v43 = vsub.f32 %v40_v19, %v115_v30 }
   0xa   :  { %v1919_v44 = vand.u32 4294901760, %v1444_v32  ;;  %v1465_v45 = vpack.c.bf16 %v67_v34, %v64_v33  ;;  %v1467_v46 = vsub.f32 %v23_v23, %v64_v33  ;;  %v167_v48 = vsub.f32 %v1412_v15, %v1917_v35 }
   0xb   :  { %1154 = vmatpush3.bf16.msra.mxu0 %v1437_v27  ;;  %v279_v47 = vsub.f32 %v1442_v31, %v1922_v41  ;;  %v174_v49 = vsub.f32 %v1422_v21, %v1916_v36  ;;  %v118_v50 = vand.u32 4294901760, %v41_v37  ;;  %v121_v52 = vand.u32 4294901760, %v42_v42 }
   0xc   :  { %1156 = vmatprep.subr.bf16.mxu0 %v1454_v39  ;;  %v286_v51 = vsub.f32 %v1444_v32, %v1919_v44  ;;  %v1914_v53 = vand.u32 4294901760, %v1433_v25  ;;  %v1913_v54 = vand.u32 4294901760, %v1435_v26  ;;  %v1491_v58 = vsub.f32 %v24_v24, %v67_v34 }
   0xd   :  { %v280_v57 = vand.u32 4294901760, %v279_v47  ;;  %v168_v59 = vand.u32 4294901760, %v167_v48  ;;  %v175_v60 = vand.u32 4294901760, %v174_v49 }
   0xe   :  { %7 = vsyncpa [#allocation4], 0  ;;  %v287_v61 = vand.u32 4294901760, %v286_v51  ;;  %v1493_v62 = vpack.c.bf16 %v121_v52, %v118_v50  ;;  %v1495_v63 = vsub.f32 %v41_v37, %v118_v50  ;;  %v293_v0 = vsub.f32 %v1433_v25, %v1914_v53  ;;  %v43_v5 = vld [vmem:[%s1899_s1 + $0xc0] sm:$0xff]  ;;  %v44_v6 = vld [vmem:[%s1899_s1 + $0xc8] sm:$0xff] }
   0xf   :  { %1158 = vmatpush3.bf16.msra.mxu0 %v1465_v45  ;;  %v1181_v1 = vpack.c.bf16 %v175_v60, %v168_v59  ;;  %v300_v2 = vsub.f32 %v1435_v26, %v1913_v54  ;;  %v70_v3 = vand.u32 4294901760, %v25_v55  ;;  %v73_v4 = vand.u32 4294901760, %v26_v56  ;;  %v27_v11 = vld [vmem:[%s1899_s1 + $0x40] sm:$0xff]  ;;  %v28_v29 = vld [vmem:[%s1899_s1 + $0x48] sm:$0xff] }
  0x10   :  { %v1179_v7 = vpack.c.bf16 %v287_v61, %v280_v57  ;;  %1160 = vmatprep.subr.bf16.mxu0 %v1493_v62  ;;  %v294_v8 = vand.u32 4294901760, %v293_v0  ;;  %v1912_v9 = vand.u32 4294901760, %v1439_v28  ;;  %v1909_v10 = vand.u32 4294901760, %v1452_v38  ;;  %v46_v57 = vld [vmem:[%s1899_s1 + $0xd8] sm:$0xff] }
  0x11   :  { %v1516_v12 = vsub.f32 %v42_v42, %v121_v52  ;;  %v301_v13 = vand.u32 4294901760, %v300_v2  ;;  %v1518_v16 = vpack.c.bf16 %v73_v4, %v70_v3  ;;  %v1520_v17 = vsub.f32 %v25_v55, %v70_v3 }
  0x12   :  { %1180 = vmatprep.subr.bf16.mxu1 %v1179_v7  ;;  %v181_v18 = vsub.f32 %v1439_v28, %v1912_v9  ;;  %v188_v19 = vsub.f32 %v1452_v38, %v1909_v10  ;;  %v124_v23 = vand.u32 4294901760, %v43_v5  ;;  %v127_v24 = vand.u32 4294901760, %v44_v6 }
  0x13   :  { %1182 = vmatpush3.bf16.msra.mxu1 %v1181_v1  ;;  %v1183_v30 = vpack.c.bf16 %v301_v13, %v294_v8  ;;  %1162 = vmatpush3.bf16.msra.mxu0 %v1518_v16  ;;  %v1907_v33 = vand.u32 4294901760, %v1456_v40  ;;  %v1906_v34 = vand.u32 4294901760, %v1462_v43  ;;  %v76_v37 = vand.u32 4294901760, %v27_v11  ;;  %v29_v1 = vld [vmem:[%s1899_s1 + $0x50] sm:$0xff] }
  0x14   :  { %v1534_v42 = vsub.f32 %v26_v56, %v73_v4  ;;  %v182_v47 = vand.u32 4294901760, %v181_v18  ;;  %v189_v48 = vand.u32 4294901760, %v188_v19  ;;  %v1536_v49 = vpack.c.bf16 %v127_v24, %v124_v23  ;;  %v45_v56 = vld [vmem:[%s1899_s1 + $0xd0] sm:$0xff]  ;;  %v30_v18 = vld [vmem:[%s1899_s1 + $0x58] sm:$0xff] }
  0x15   :  { %1184 = vmatprep.subr.bf16.mxu1 %v1183_v30  ;;  %v1538_v50 = vsub.f32 %v43_v5, %v124_v23  ;;  %v307_v51 = vsub.f32 %v1456_v40, %v1907_v33  ;;  %v314_v52 = vsub.f32 %v1462_v43, %v1906_v34  ;;  %v79_v55 = vand.u32 4294901760, %v28_v29 }
  0x16   :  { %v1185_v59 = vpack.c.bf16 %v189_v48, %v182_v47  ;;  %1164 = vmatprep.subr.bf16.mxu0 %v1536_v49  ;;  %v1553_v60 = vsub.f32 %v44_v6, %v127_v24  ;;  %v1904_v61 = vand.u32 4294901760, %v1467_v46  ;;  %v1903_v0 = vand.u32 4294901760, %v1491_v58 }
  0x17   :  { %v308_v2 = vand.u32 4294901760, %v307_v51  ;;  %v315_v3 = vand.u32 4294901760, %v314_v52  ;;  %v1560_v4 = vpack.c.bf16 %v79_v55, %v76_v37  ;;  %v1562_v5 = vsub.f32 %v27_v11, %v76_v37 }
  0x18   :  { %1186 = vmatpush3.bf16.msra.mxu1 %v1185_v59  ;;  %v195_v6 = vsub.f32 %v1467_v46, %v1904_v61  ;;  %v202_v7 = vsub.f32 %v1491_v58, %v1903_v0  ;;  %v130_v8 = vand.u32 4294901760, %v45_v56  ;;  %v133_v13 = vand.u32 4294901760, %v46_v57 }
  0x19   :  { %v1187_v19 = vpack.c.bf16 %v315_v3, %v308_v2  ;;  %1166 = vmatpush3.bf16.msra.mxu0 %v1560_v4  ;;  %v1902_v11 = vand.u32 4294901760, %v1495_v63  ;;  %v1901_v23 = vand.u32 4294901760, %v1516_v12  ;;  %v82_v24 = vand.u32 4294901760, %v29_v1 }
  0x1a   :  { %v1576_v30 = vsub.f32 %v28_v29, %v79_v55  ;;  %v196_v37 = vand.u32 4294901760, %v195_v6  ;;  %v203_v47 = vand.u32 4294901760, %v202_v7  ;;  %v1578_v48 = vpack.c.bf16 %v133_v13, %v130_v8  ;;  %v47_v29 = vld [vmem:[%s1899_s1 + $0xe0] sm:$0xff]  ;;  %v48_v55 = vld [vmem:[%s1899_s1 + $0xe8] sm:$0xff] }
  0x1b   :  { %1188 = vmatprep.subr.bf16.mxu1 %v1187_v19  ;;  %v1580_v51 = vsub.f32 %v45_v56, %v130_v8  ;;  %v321_v52 = vsub.f32 %v1495_v63, %v1902_v11  ;;  %v328_v59 = vsub.f32 %v1516_v12, %v1901_v23  ;;  %v85_v2 = vand.u32 4294901760, %v30_v18  ;;  %v31_v8 = vld [vmem:[%s1899_s1 + $0x60] sm:$0xff] }
  0x1c   :  { %v1189_v3 = vpack.c.bf16 %v203_v47, %v196_v37  ;;  %1168 = vmatprep.subr.bf16.mxu0 %v1578_v48  ;;  %v1595_v56 = vsub.f32 %v46_v57, %v133_v13  ;;  %v1905_v6 = vand.u32 4294901760, %v1520_v17  ;;  %v1908_v7 = vand.u32 4294901760, %v1534_v42 }
  0x1d   :  { %v322_v19 = vand.u32 4294901760, %v321_v52  ;;  %v329_v23 = vand.u32 4294901760, %v328_v59  ;;  %v1602_v11 = vpack.c.bf16 %v85_v2, %v82_v24  ;;  %v1604_v0 = vsub.f32 %v29_v1, %v82_v24  ;;  %v32_v52 = vld [vmem:[%s1899_s1 + $0x68] sm:$0xff] }
  0x1e   :  { %1190 = vmatpush3.bf16.msra.mxu1 %v1189_v3  ;;  %v209_v57 = vsub.f32 %v1520_v17, %v1905_v6  ;;  %v216_v13 = vsub.f32 %v1534_v42, %v1908_v7  ;;  %v136_v37 = vand.u32 4294901760, %v47_v29  ;;  %v139_v47 = vand.u32 4294901760, %v48_v55 }
  0x1f   :  { %1946 = vst [vmem:[#allocation6_spill] sm:$0xff] %v1602_v11  ;;  %v1191_v59 = vpack.c.bf16 %v329_v23, %v322_v19  ;;  %1170 = vmatpush3.bf16.msra.mxu0 %v1602_v11  ;;  %v1911_v1 = vand.u32 4294901760, %v1538_v50  ;;  %v1910_v24 = vand.u32 4294901760, %v1553_v60  ;;  %v88_v3 = vand.u32 4294901760, %v31_v8 }
  0x20   :  { %v1618_v61 = vsub.f32 %v30_v18, %v85_v2  ;;  %v210_v6 = vand.u32 4294901760, %v209_v57  ;;  %v217_v34 = vand.u32 4294901760, %v216_v13  ;;  %v1620_v33 = vpack.c.bf16 %v139_v47, %v136_v37  ;;  %v49_v18 = vld [vmem:[%s1899_s1 + $0xf0] sm:$0xff]  ;;  %v50_v2 = vld [vmem:[%s1899_s1 + $0xf8] sm:$0xff] }
  0x21   :  { %1192 = vmatprep.subr.bf16.mxu1 %v1191_v59  ;;  %v1622_v7 = vsub.f32 %v47_v29, %v136_v37  ;;  %v335_v23 = vsub.f32 %v1538_v50, %v1911_v1  ;;  %v342_v19 = vsub.f32 %v1553_v60, %v1910_v24  ;;  %v91_v10 = vand.u32 4294901760, %v32_v52  ;;  %v33_v59 = vld [vmem:[%s1899_s1 + $0x70] sm:$0xff] }
  0x22   :  { %1947 = vst [vmem:[#allocation7_spill] sm:$0xff] %v1620_v33  ;;  %v1193_v57 = vpack.c.bf16 %v217_v34, %v210_v6  ;;  %1172 = vmatprep.subr.bf16.mxu0 %v1620_v33  ;;  %v1637_v29 = vsub.f32 %v48_v55, %v139_v47  ;;  %v1915_v13 = vand.u32 4294901760, %v1562_v5  ;;  %v1918_v37 = vand.u32 4294901760, %v1576_v30 }
  0x23   :  { %v336_v24 = vand.u32 4294901760, %v335_v23  ;;  %v343_v1 = vand.u32 4294901760, %v342_v19  ;;  %v1644_v9 = vpack.c.bf16 %v91_v10, %v88_v3  ;;  %v1646_v54 = vsub.f32 %v31_v8, %v88_v3  ;;  %v34_v23 = vld [vmem:[%s1899_s1 + $0x78] sm:$0xff] }
  0x24   :  { %1194 = vmatpush3.bf16.msra.mxu1 %v1193_v57  ;;  %v223_v34 = vsub.f32 %v1562_v5, %v1915_v13  ;;  %v230_v55 = vsub.f32 %v1576_v30, %v1918_v37  ;;  %v142_v6 = vand.u32 4294901760, %v49_v18  ;;  %v145_v47 = vand.u32 4294901760, %v50_v2 }
  0x25   :  { %1948 = vst [vmem:[#allocation8_spill] sm:$0xff] %v1644_v9  ;;  %v1195_v19 = vpack.c.bf16 %v343_v1, %v336_v24  ;;  %1174 = vmatpush3.bf16.msra.mxu0 %v1644_v9  ;;  %v1921_v8 = vand.u32 4294901760, %v1580_v51  ;;  %v1920_v3 = vand.u32 4294901760, %v1595_v56  ;;  %v94_v57 = vand.u32 4294901760, %v33_v59 }
  0x26   :  { %v1660_v53 = vsub.f32 %v32_v52, %v91_v10  ;;  %v224_v13 = vand.u32 4294901760, %v223_v34  ;;  %v231_v36 = vand.u32 4294901760, %v230_v55  ;;  %v1662_v35 = vpack.c.bf16 %v145_v47, %v142_v6  ;;  %v18_v10 = vld [vmem:[%s1898_s0 + $0x8] sm:$0xff] }
  0x27   :  { %1196 = vmatprep.subr.bf16.mxu1 %v1195_v19  ;;  %v1664_v37 = vsub.f32 %v49_v18, %v142_v6  ;;  %v349_v1 = vsub.f32 %v1580_v51, %v1921_v8  ;;  %v356_v24 = vsub.f32 %v1595_v56, %v1920_v3  ;;  %v97_v44 = vand.u32 4294901760, %v34_v23  ;;  %v17_v6 = vld [vmem:[%s1898_s0] sm:$0xff]  ;;  %s1368_s0 = smov [#allocation3]  }
  0x28   :  { %1949 = vst [vmem:[#allocation9_spill] sm:$0xff] %v1662_v35  ;;  %v1197_v52 = vpack.c.bf16 %v231_v36, %v224_v13  ;;  %1176 = vmatprep.subr.bf16.mxu0 %v1662_v35  ;;  %v1676_v34 = vsub.f32 %v50_v2, %v145_v47  ;;  %v1925_v18 = vand.u32 4294901760, %v1604_v0  ;;  %v1926_v55 = vand.u32 4294901760, %v1618_v61  ;;  %s926_s20 = sshll.u32 %s1368_s0, 4  ;;  %s927_s20 = int_to_ptr.vmem [resolvable:$true] %s926_s20 }
  0x29   :  { %v350_v19 = vand.u32 4294901760, %v349_v1  ;;  %v357_v3 = vand.u32 4294901760, %v356_v24  ;;  %v1683_v8 = vpack.c.bf16 %v97_v44, %v94_v57  ;;  %v1685_v41 = vsub.f32 %v33_v59, %v94_v57  ;;  %s1343_s21 = scalar_lea.vmem %s927_s20, 256  ;;  %p1348_p1 = scmp.lt.s32.totalorder %s927_s20, %s927_s20 }
  0x2a   :  { %1198 = vmatpush3.bf16.msra.mxu1 %v1197_v52  ;;  %v237_v36 = vsub.f32 %v1604_v0, %v1925_v18  ;;  %v244_v2 = vsub.f32 %v1618_v61, %v1926_v55  ;;  %v1693_v13 = vand.u32 4294901760, %v18_v10  ;;  %v1929_v47 = vand.u32 4294901760, %v1622_v7  ;;  %p1344_p0 = scmp.ne.s32.totalorder %s927_s20, %s1343_s21  ;;  %p1349_p2 = scmp.lt.s32.totalorder %s1343_s21, %s1343_s21 }
  0x2b   :  { %1950 = vst [vmem:[#allocation10_spill] sm:$0xff] %v1683_v8  ;;  %v1199_v35 = vpack.c.bf16 %v357_v3, %v350_v19  ;;  %1178 = vmatpush3.bf16.msra.mxu0 %v1683_v8  ;;  %v1935_v1 = vand.u32 4294901760, %v1637_v29  ;;  %v1211_v59 = vpack.c.bf16 %v1444_v32, %v1442_v31  ;;  %v1700_v57 = vand.u32 4294901760, %v17_v6 }
  0x2c   :  { %1951 = vst [vmem:[#allocation11_spill] sm:$0xff] %v1693_v13  ;;  %v238_v24 = vand.u32 4294901760, %v237_v36  ;;  %v245_v52 = vand.u32 4294901760, %v244_v2  ;;  %v1703_v18 = vsub.f32 %v18_v10, %v1693_v13  ;;  %v363_v55 = vsub.f32 %v1622_v7, %v1929_v47  ;;  %388 = vmatprep.mubr.f32.mxu1 %v1693_v13  ;;  %p1350_p3 = por %p1349_p2, %p1348_p1 }
  0x2d   :  { %1200 = vmatprep.subr.bf16.mxu1 %v1199_v35  ;;  %v370_v3 = vsub.f32 %v1637_v29, %v1935_v1  ;;  %1212 = vmatprep.subr.bf16.mxu0 %v1211_v59  ;;  %v1713_v19 = vsub.f32 %v17_v6, %v1700_v57  ;;  %v1934_v36 = vand.u32 4294901760, %v1646_v54  ;;  %v1936_v10 = vand.u32 4294901760, %v1660_v53 }
  0x2e   :  { %v1717_v2 = vsub.f32 %v34_v23, %v97_v44  ;;  %v1201_v8 = vpack.c.bf16 %v245_v52, %v238_v24  ;;  %v1937_v47 = vand.u32 4294901760, %v1703_v18  ;;  %v364_v9 = vand.u32 4294901760, %v363_v55  ;;  %p1351_p4 = pnand %p1350_p3, %p1344_p0 }
  0x2f   :  { %v371_v13 = vand.u32 4294901760, %v370_v3  ;;  %v155_v35 = vand.u32 4294901760, %v1713_v19  ;;  %v251_v59 = vsub.f32 %v1646_v54, %v1934_v36  ;;  %v258_v6 = vsub.f32 %v1660_v53, %v1936_v10 }
  0x30   :  { %1202 = vmatpush3.bf16.msra.mxu1 %v1201_v8  ;;  %v150_v44 = vsub.f32 %v1703_v18, %v1937_v47  ;;  %v1213_v23 = vpack.c.bf16 %v1422_v21, %v1412_v15  ;;  %v1942_v55 = vand.u32 4294901760, %v1664_v37  ;;  %v1945_v24 = vand.u32 4294901760, %v1676_v34 }
  0x31   :  { %v1203_v52 = vpack.c.bf16 %v371_v13, %v364_v9  ;;  %v156_v3 = vsub.f32 %v1713_v19, %v155_v35  ;;  %v252_v36 = vand.u32 4294901760, %v251_v59  ;;  %v259_v1 = vand.u32 4294901760, %v258_v6 }
  0x32   :  { %v151_v10 = vand.u32 4294901760, %v150_v44  ;;  %v377_v8 = vsub.f32 %v1664_v37, %v1942_v55  ;;  %v384_v47 = vsub.f32 %v1676_v34, %v1945_v24  ;;  %v1944_v33 = vand.u32 4294901760, %v1685_v41 }
  0x33   :  { %1204 = vmatprep.subr.bf16.mxu1 %v1203_v52  ;;  %v157_v11 = vand.u32 4294901760, %v156_v3  ;;  %v1205_v9 = vpack.c.bf16 %v259_v1, %v252_v36  ;;  %v1215_v13 = vpack.c.bf16 %v1435_v26, %v1433_v25  ;;  %v1943_v59 = vand.u32 4294901760, %v1717_v2 }
  0x34   :  { %152 = vmatprep.mubr.f32.mxu0 %v151_v10  ;;  %v378_v6 = vand.u32 4294901760, %v377_v8  ;;  %v385_v44 = vand.u32 4294901760, %v384_v47  ;;  %v265_v55 = vsub.f32 %v1685_v41, %v1944_v33  ;;  %v1217_v3 = vpack.c.bf16 %v1452_v38, %v1439_v28 }
  0x35   :  { %158 = vmatmul.mubr.f32.vlgmr.msra.gmra.mrb[0].mxu0 %v157_v11  ;;  %1206 = vmatpush3.bf16.msra.mxu1 %v1205_v9  ;;  %v272_v52 = vsub.f32 %v1717_v2, %v1943_v59  ;;  %v1219_v10 = vpack.c.bf16 %v1462_v43, %v1456_v40  ;;  %v1221_v11 = vpack.c.bf16 %v1491_v58, %v1467_v46  ;;  %v1953_v9 = vand.u32 4294901760, %v1444_v32 }
  0x36   :  { %1214 = vmatpush3.bf16.msra.mxu0 %v1213_v23  ;;  %v1207_v1 = vpack.c.bf16 %v385_v44, %v378_v6  ;;  %v266_v36 = vand.u32 4294901760, %v265_v55  ;;  %525 = vmatprep.mubr.f32.mxu0 %v1703_v18  ;;  %v1223_v8 = vpack.c.bf16 %v1516_v12, %v1495_v63  ;;  %v1952_v55 = vand.u32 4294901760, %v1442_v31 }
  0x37   :  { %1216 = vmatprep.subr.bf16.mxu0 %v1215_v13  ;;  %v273_v47 = vand.u32 4294901760, %v272_v52  ;;  %v1954_v44 = vand.u32 4294901760, %v1412_v15  ;;  %v1955_v13 = vand.u32 4294901760, %v1422_v21  ;;  %v1956_v59 = vand.u32 4294901760, %v1433_v25 }
  0x38   :  { %1208 = vmatprep.subr.bf16.mxu1 %v1207_v1  ;;  %v1275_v6 = vpack.c.bf16 %v1953_v9, %v1952_v55  ;;  %v1957_v1 = vand.u32 4294901760, %v1435_v26  ;;  %v1958_v24 = vand.u32 4294901760, %v1439_v28  ;;  %v1960_v31 = vand.u32 4294901760, %v1456_v40 }
  0x39   :  { %v1209_v23 = vpack.c.bf16 %v273_v47, %v266_v36  ;;  %v1277_v52 = vpack.c.bf16 %v1955_v13, %v1954_v44  ;;  %v1959_v36 = vand.u32 4294901760, %v1452_v38  ;;  %v1961_v32 = vand.u32 4294901760, %v1462_v43  ;;  %v1976_v13 = vld [vmem:[#allocation8_spill] sm:$0xff] }
  0x3a   :  { %v1279_v33 = vpack.c.bf16 %v1957_v1, %v1956_v59  ;;  %1218 = vmatpush3.bf16.msra.mxu0 %v1217_v3  ;;  %v1962_v15 = vand.u32 4294901760, %v1467_v46  ;;  %v1963_v21 = vand.u32 4294901760, %v1491_v58  ;;  %v1964_v25 = vand.u32 4294901760, %v1495_v63  ;;  %v1977_v1 = vld [vmem:[#allocation9_spill] sm:$0xff] }
  0x3b   :  { %v1281_v47 = vpack.c.bf16 %v1959_v36, %v1958_v24  ;;  %v1283_v55 = vpack.c.bf16 %v1961_v32, %v1960_v31  ;;  %v1965_v26 = vand.u32 4294901760, %v1516_v12  ;;  %1210 = vmatpush3.bf16.msra.mxu1 %v1209_v23  ;;  %1220 = vmatprep.subr.bf16.mxu0 %v1219_v10  ;;  %v1966_v28 = vand.u32 4294901760, %v1520_v17  ;;  %v1978_v36 = vld [vmem:[#allocation10_spill] sm:$0xff] }
  0x3c   :  { %v1285_v9 = vpack.c.bf16 %v1963_v21, %v1962_v15  ;;  %v1967_v38 = vand.u32 4294901760, %v1534_v42  ;;  %v1968_v43 = vand.u32 4294901760, %v1538_v50  ;;  %v1969_v24 = vand.u32 4294901760, %v1553_v60  ;;  %1244 = vmatprep.subr.bf16.mxu1 %v1410_v14 }
  0x3d   :  { %v1287_v59 = vpack.c.bf16 %v1965_v26, %v1964_v25  ;;  %v1970_v58 = vand.u32 4294901760, %v1562_v5  ;;  %v1971_v3 = vand.u32 4294901760, %v1576_v30  ;;  %v1225_v12 = vpack.c.bf16 %v1534_v42, %v1520_v17 }
  0x3e   :  { %v1289_v40 = vpack.c.bf16 %v1967_v38, %v1966_v28  ;;  %v1291_v46 = vpack.c.bf16 %v1969_v24, %v1968_v43  ;;  %390 = vmatmul.mubr.f32.vlgmr.msra.gmra.mrb[0].mxu1 %v1700_v57  ;;  %1222 = vmatpush3.bf16.msra.mxu0 %v1221_v11  ;;  %v1227_v10 = vpack.c.bf16 %v1553_v60, %v1538_v50  ;;  %v1972_v23 = vand.u32 4294901760, %v1703_v18  ;;  %v1973_v18 = vld [vmem:[#allocation6_spill] sm:$0xff]  ;;  %v1974_v11 = vld [vmem:[#allocation7_spill] sm:$0xff] }
  0x3f   :  { %v1293_v63 = vpack.c.bf16 %v1971_v3, %v1970_v58  ;;  %1246 = vmatpush3.bf16.msra.mxu1 %v1420_v20  ;;  %1224 = vmatprep.subr.bf16.mxu0 %v1223_v8  ;;  %v1229_v44 = vpack.c.bf16 %v1576_v30, %v1562_v5  ;;  %v1231_v17 = vpack.c.bf16 %v1595_v56, %v1580_v51  ;;  %v1975_v8 = vld [vmem:[#allocation11_spill] sm:$0xff]  ;;  %vm12_vm0 = vcmask 517120  }
  0x40   :  { %1248 = vmatprep.subr.bf16.mxu1 %v1424_v22  ;;  %632 = vmatprep.mubr.f32.mxu1 %v1972_v23  ;;  %v1233_v42 = vpack.c.bf16 %v1618_v61, %v1604_v0  ;;  %v1235_v50 = vpack.c.bf16 %v1637_v29, %v1622_v7  ;;  %v1237_v60 = vpack.c.bf16 %v1660_v53, %v1646_v54  ;;  %vm913_vm1 = vcmask 523264  }
  0x41   :  { %v1239_v5 = vpack.c.bf16 %v1676_v34, %v1664_v37  ;;  %v1241_v30 = vpack.c.bf16 %v1717_v2, %v1685_v41  ;;  %vm916_vm2 = vcmask 519168  }
  0x42   :  { %1226 = vmatpush3.bf16.msra.mxu0 %v1225_v12 }
  0x43   :  { %1250 = vmatpush3.bf16.msra.mxu1 %v1437_v27  ;;  %1228 = vmatprep.subr.bf16.mxu0 %v1227_v10 }
  0x44   :  { %1252 = vmatprep.subr.bf16.mxu1 %v1454_v39 }
  0x46   :  { %1230 = vmatpush3.bf16.msra.mxu0 %v1229_v44 }
  0x47   :  { %1254 = vmatpush3.bf16.msra.mxu1 %v1465_v45  ;;  %1232 = vmatprep.subr.bf16.mxu0 %v1231_v17 }
  0x48   :  { %1256 = vmatprep.subr.bf16.mxu1 %v1493_v62 }
  0x4a   :  { %1234 = vmatpush3.bf16.msra.mxu0 %v1233_v42 }
  0x4b   :  { %1258 = vmatpush3.bf16.msra.mxu1 %v1518_v16  ;;  %1236 = vmatprep.subr.bf16.mxu0 %v1235_v50 }
  0x4c   :  { %1260 = vmatprep.subr.bf16.mxu1 %v1536_v49 }
  0x4e   :  { %1238 = vmatpush3.bf16.msra.mxu0 %v1237_v60 }
  0x4f   :  { %1262 = vmatpush3.bf16.msra.mxu1 %v1560_v4  ;;  %1240 = vmatprep.subr.bf16.mxu0 %v1239_v5 }
  0x50   :  { %1264 = vmatprep.subr.bf16.mxu1 %v1578_v48 }
  0x52   :  { %1242 = vmatpush3.bf16.msra.mxu0 %v1241_v30 }
  0x53   :  { %1266 = vmatpush3.bf16.msra.mxu1 %v1973_v18  ;;  %1276 = vmatprep.subr.bf16.mxu0 %v1275_v6  ;;  %v1980_v6 = vand.u32 4294901760, %v1595_v56 }
  0x54   :  { %1268 = vmatprep.subr.bf16.mxu1 %v1974_v11 }
  0x55   :  { %528 = vmatmul.mubr.f32.vlgmr.msra.gmra.mrb[2].mxu0 %v1713_v19  ;;  %v1981_v19 = vand.u32 4294901760, %v1604_v0 }
  0x56   :  { %1278 = vmatpush3.bf16.msra.mxu0 %v1277_v52  ;;  %802 = vmatprep.mubr.f32.mxu0 %v1975_v8 }
  0x57   :  { %1270 = vmatpush3.bf16.msra.mxu1 %v1976_v13  ;;  %1280 = vmatprep.subr.bf16.mxu0 %v1279_v33  ;;  %v1979_v33 = vand.u32 4294901760, %v1580_v51  ;;  %v1985_v51 = vand.u32 4294901760, %v1646_v54 }
  0x58   :  { %1272 = vmatprep.subr.bf16.mxu1 %v1977_v1 }
  0x5a   :  { %1282 = vmatpush3.bf16.msra.mxu0 %v1281_v47 }
  0x5b   :  { %1274 = vmatpush3.bf16.msra.mxu1 %v1978_v36  ;;  %1284 = vmatprep.subr.bf16.mxu0 %v1283_v55 }
  0x5c   :  { %1308 = vmatprep.subr.bf16.mxu1 %v1410_v14  ;;  %v1295_v14 = vpack.c.bf16 %v1980_v6, %v1979_v33 }
  0x5e   :  { %636 = vmatmul.mubr.f32.vlgmr.msra.gmra.mrb[2].mxu1 %v155_v35  ;;  %1286 = vmatpush3.bf16.msra.mxu0 %v1285_v9 }
  0x5f   :  { %1310 = vmatpush3.bf16.msra.mxu1 %v1420_v20  ;;  %1288 = vmatprep.subr.bf16.mxu0 %v1287_v59  ;;  %v1982_v20 = vand.u32 4294901760, %v1618_v61  ;;  %v1987_v61 = vand.u32 4294901760, %v1664_v37 }
  0x60   :  { %1312 = vmatprep.subr.bf16.mxu1 %v1424_v22  ;;  %906 = vmatprep.mubr.f32.mxu1 %v1975_v8  ;;  %v1983_v22 = vand.u32 4294901760, %v1622_v7  ;;  %v1989_v7 = vand.u32 4294901760, %v1685_v41  ;;  %v1367_v41 = vmov 0.0  }
  0x61   :  { %v1297_v35 = vpack.c.bf16 %v1982_v20, %v1981_v19  ;;  %13 = vst.msk [vmem:[#allocation3] sm:$0x3] %vm12_vm0, %v1367_v41  ;;  %14 = vst.msk [vmem:[#allocation3 + $0x8] sm:$0x3] %vm12_vm0, %v1367_v41 }
  0x62   :  { %1290 = vmatpush3.bf16.msra.mxu0 %v1289_v40  ;;  %15 = vst.msk [vmem:[#allocation3 + $0x6] sm:$0x3] %vm12_vm0, %v1367_v41  ;;  %16 = vst.msk [vmem:[#allocation3 + $0xe] sm:$0x3] %vm12_vm0, %v1367_v41 }
  0x63   :  { %1314 = vmatpush3.bf16.msra.mxu1 %v1437_v27  ;;  %1292 = vmatprep.subr.bf16.mxu0 %v1291_v46  ;;  %v1984_v27 = vand.u32 4294901760, %v1637_v29 }
  0x64   :  { %1316 = vmatprep.subr.bf16.mxu1 %v1454_v39  ;;  %v1986_v39 = vand.u32 4294901760, %v1660_v53 }
  0x65   :  { %v1299_v52 = vpack.c.bf16 %v1984_v27, %v1983_v22 }
  0x66   :  { %1294 = vmatpush3.bf16.msra.mxu0 %v1293_v63  ;;  %v1301_v56 = vpack.c.bf16 %v1986_v39, %v1985_v51 }
  0x67   :  { %1318 = vmatpush3.bf16.msra.mxu1 %v1465_v45  ;;  %1296 = vmatprep.subr.bf16.mxu0 %v1295_v14  ;;  %v1988_v45 = vand.u32 4294901760, %v1676_v34 }
  0x68   :  { %1320 = vmatprep.subr.bf16.mxu1 %v1493_v62  ;;  %v1990_v62 = vand.u32 4294901760, %v1717_v2 }
  0x69   :  { %v1303_v0 = vpack.c.bf16 %v1988_v45, %v1987_v61 }
  0x6a   :  { %1298 = vmatpush3.bf16.msra.mxu0 %v1297_v35  ;;  %v1305_v29 = vpack.c.bf16 %v1990_v62, %v1989_v7 }
  0x6b   :  { %1322 = vmatpush3.bf16.msra.mxu1 %v1518_v16  ;;  %1300 = vmatprep.subr.bf16.mxu0 %v1299_v52 }
  0x6c   :  { %1324 = vmatprep.subr.bf16.mxu1 %v1536_v49 }
  0x6e   :  { %1302 = vmatpush3.bf16.msra.mxu0 %v1301_v56 }
  0x6f   :  { %1326 = vmatpush3.bf16.msra.mxu1 %v1560_v4  ;;  %1304 = vmatprep.subr.bf16.mxu0 %v1303_v0 }
  0x70   :  { %1328 = vmatprep.subr.bf16.mxu1 %v1578_v48 }
  0x72   :  { %1306 = vmatpush3.bf16.msra.mxu0 %v1305_v29 }
  0x73   :  { %1330 = vmatpush3.bf16.msra.mxu1 %v1973_v18 }
  0x74   :  { %1332 = vmatprep.subr.bf16.mxu1 %v1974_v11 }
  0x75   :  { %804 = vmatmul.mubr.f32.vlgmr.msra.gmra.mrb[4].mxu0 %v1700_v57 }
  0x77   :  { %1334 = vmatpush3.bf16.msra.mxu1 %v1976_v13 }
  0x78   :  { %1336 = vmatprep.subr.bf16.mxu1 %v1977_v1 }
  0x7b   :  { %1338 = vmatpush3.bf16.msra.mxu1 %v1978_v36 }
  0x7e   :  { %908 = vmatmul.mubr.f32.vlgmr.msra.gmra.mrb[4].mxu1 %v1700_v57 }
 0x108   :  { %v969_v53 = vpop.f32.mrb[0].mxu0 }
 0x109   :  { %v970_v54 = vpop.f32.mrb[1].mxu0 }
 0x10a   :  { %v971_v16 = vadd.f32 %v970_v54, %v969_v53 }
 0x111   :  { %v1004_v49 = vpop.f32.mrb[0].mxu1 }
 0x112   :  { %v1005_v4 = vpop.f32.mrb[1].mxu1 }
 0x113   :  { %v1006_v48 = vadd.f32 %v1005_v4, %v1004_v49 }
 0x115   :  { %v392_v37 = vadd.f32 %v1006_v48, %v971_v16 }
 0x128   :  { %v1039_v34 = vpop.f32.mrb[2].mxu0 }
 0x129   :  { %v1040_v2 = vpop.f32.mrb[3].mxu0 }
 0x12a   :  { %v1041_v47 = vadd.f32 %v1040_v2, %v1039_v34 }
 0x12c   :  { %v530_v31 = vadd.f32 %v1041_v47, %v392_v37 }
 0x131   :  { %v1074_v32 = vpop.f32.mrb[2].mxu1 }
 0x132   :  { %v1075_v55 = vpop.f32.mrb[3].mxu1 }
 0x133   :  { %v1076_v57 = vadd.f32 %v1075_v55, %v1074_v32 }
 0x135   :  { %v638_v15 = vadd.f32 %v1076_v57, %v530_v31 }
 0x148   :  { %v1109_v21 = vpop.f32.mrb[4].mxu0 }
 0x149   :  { %v1110_v9 = vpop.f32.mrb[5].mxu0 }
 0x14a   :  { %v1111_v25 = vadd.f32 %v1110_v9, %v1109_v21 }
 0x14c   :  { %v806_v26 = vadd.f32 %v1111_v25, %v638_v15 }
 0x151   :  { %v1144_v59 = vpop.f32.mrb[4].mxu1 }
 0x152   :  { %v1145_v28 = vpop.f32.mrb[5].mxu1 }
 0x153   :  { %v1146_v38 = vadd.f32 %v1145_v28, %v1144_v59 }
 0x155   :  { %v910_v40 = vadd.f32 %v1146_v38, %v806_v26 }
 0x157   :  { %914 = vst.msk [vmem:[#allocation2] sm:$0xff] %vm913_vm1, %v910_v40 }
 0x15e   :  { %v915_v43 = vld [vmem:[#allocation2] sm:$0xf]  ;;  %v918_v24 = vld [vmem:[#allocation2 + $0x4] sm:$0xf] }
 0x15f   :  { %917 = vst.msk [vmem:[#allocation3 + $0x2] sm:$0xf] %vm916_vm2, %v915_v43  ;;  %920 = vst.msk [vmem:[#allocation3 + $0xa] sm:$0xf] %vm916_vm2, %v918_v24 }
 0x160   :  { %1354 = shalt.err (!%p1351_p4)
}
 0x161   :  { %s1355_s24 = scalar_lea.hbm %s1900_s2, 256 }
 0x162   :  { %p1356_p5 = scmp.ne.s32.totalorder %s1900_s2, %s1355_s24  ;;  %p1359_p6 = scmp.lt.u32.totalorder %s1355_s24, %s1900_s2 }
 0x164   :  { %p1361_p7 = pnand %p1359_p6, %p1356_p5 }
 0x166   :  { %1364 = shalt.err (!%p1361_p7)
}
 0x167   :  { %s1369_s29 = smov 128   ;;  %s1370_s30 = smov 8  }
 0x168   :  { %932 = dma.vmem_to_hbm [thread:$0]  %s927_s20, 256, %s1900_s2, [#allocation4], %s1369_s29, %s1369_s29, %s1370_s30  }
 0x169   :  { %1365 = dma.done.wait [#allocation4], 256  }
 0x16a   :  { %1366 = vsyncadd [#allocation4], 4294967040 }
 0x16b   :  { %936 = vsyncpa [#allocation4], 1 }

</bundles_post_ra>
